<compile_context>
chip_gen: v7x
topology: tpu7x:2x2x1
jax: 0.10.0
libtpu: 0.0.40
codegen_flags: <defaults>
</compile_context>

<pallas_src>
import jax
import jax.numpy as jnp
from jax.experimental import pallas as pl
from jax.experimental.pallas import tpu as pltpu


_BLOCK_BYTES = 2 * 1024 * 1024  # per-input row-block byte budget


def _pick_row_tile(C, itemsize, block_bytes=_BLOCK_BYTES):
    """Row-block height budgeted by bytes (multiple of 8), or full residency."""
    rows = (block_bytes // (itemsize * C)) // 8 * 8
    rows = max(rows, 8)
    if rows >= C:
        return C            # whole matrix fits in one block
    return rows


def _make_kernel(B, C, tile_r, inv_scale, has_tail):
    def kernel(tgt_ref, x_ref, dist_ref, dist0_ref, dist_hbm_ref, out_ref,
               sdv_ref, acc_ref, gather_sem):
        # tgt_ref     : SMEM (B,)          int32 targets (scalar prefetch)
        # x_ref       : VMEM (B, C)        logits (same block every step)
        # dist_ref    : VMEM (tile_r, C)   learnable distance-matrix row block
        # dist0_ref   : VMEM (tile_r, C)   initial distance-matrix row block
        # dist_hbm_ref: HBM  (C, C)        raw ref for the target-row DMA gather
        # out_ref     : SMEM (1,)          scalar loss
        # sdv_ref     : VMEM (B, C)        gathered dist rows (DMA destination)
        # acc_ref     : VMEM (tile_r, C)   f32 element-wise Frobenius accumulator
        # gather_sem  : DMA semaphores (B,)
        r = pl.program_id(0)
        last = pl.num_programs(0) - 1

        @pl.when(r == 0)
        def _prologue():
            acc_ref[...] = jnp.zeros_like(acc_ref)
            # Issue the B target-row gathers once; they overlap with the
            # streamed Frobenius loop and are consumed only in the last step.
            for i in range(B):
                # TODO(synk): PyTorch indexing would raise on out-of-range
                # targets; here they are clamped to keep the DMA in bounds.
                t = jnp.clip(tgt_ref[i], 0, C - 1)
                pltpu.make_async_copy(
                    dist_hbm_ref.at[pl.ds(t, 1), :],
                    sdv_ref.at[pl.ds(i, 1), :],
                    gather_sem.at[i],
                ).start()

        # ---- streamed Frobenius term: pure vld + VPU adds each block ----
        diff = dist_ref[...].astype(jnp.float32) - dist0_ref[...].astype(jnp.float32)
        if has_tail:
            # Last block is padded past C rows; mask padded rows (select, so
            # undefined padding values never propagate).
            row_ids = jax.lax.broadcasted_iota(jnp.int32, (tile_r, 1), 0) + r * tile_r
            diff = jnp.where(row_ids < C, diff, 0.0)
        acc_ref[...] = acc_ref[...] + diff * diff

        # ---- finalize once at the last row block ----
        @pl.when(r == last)
        def _fin():
            for i in range(B):
                pltpu.make_async_copy(
                    dist_hbm_ref.at[pl.ds(0, 1), :],
                    sdv_ref.at[pl.ds(i, 1), :],
                    gather_sem.at[i],
                ).wait()
            x = x_ref[...].astype(jnp.float32)
            m = jnp.max(x, axis=-1, keepdims=True)
            lse = jnp.log(jnp.sum(jnp.exp(x - m), axis=-1, keepdims=True)) + m
            log_sm = x - lse                                          # (B, C)
            # inclusive regularizer: -sum(sdv * log_softmax(x)) / B / 10
            reg = -jnp.sum(sdv_ref[...].astype(jnp.float32) * log_sm) * inv_scale
            # 0.5 * torch.dist(dist, dist0, 2)^2 == 0.5 * ||dist - dist0||_F^2
            out_ref[0] = reg + 0.5 * jnp.sum(acc_ref[...])

    return kernel


@jax.jit
def inclusive_loss(x, target, distance_matrix, distance_matrix_initial):
    B, C = x.shape
    itemsize = jnp.dtype(distance_matrix.dtype).itemsize
    tile_r = _pick_row_tile(C, itemsize)
    R = pl.cdiv(C, tile_r)
    has_tail = (C % tile_r) != 0
    inv_scale = 1.0 / (10.0 * B)          # fold "/ B / 10" into one multiply

    kernel = _make_kernel(B, C, tile_r, inv_scale, has_tail)

    cost = pl.CostEstimate(
        flops=int(3 * C * C + 8 * B * C),
        transcendentals=int(B * C + B),
        bytes_accessed=int(itemsize * (2 * C * C + B * C) + 4 * (B * C + B) + 4),
    )

    grid_spec = pltpu.PrefetchScalarGridSpec(
        num_scalar_prefetch=1,               # target indices land in SMEM
        grid=(R,),                           # row blocks of the (C, C) matrices
        in_specs=[
            pl.BlockSpec((B, C), lambda r, tgt: (0, 0)),       # logits, resident
            pl.BlockSpec((tile_r, C), lambda r, tgt: (r, 0)),  # dist row block
            pl.BlockSpec((tile_r, C), lambda r, tgt: (r, 0)),  # dist0 row block
            pl.BlockSpec(memory_space=pl.ANY),                 # dist, raw HBM
        ],
        out_specs=pl.BlockSpec(memory_space=pltpu.MemorySpace.SMEM),
        scratch_shapes=[
            pltpu.VMEM((B, C), distance_matrix.dtype),  # gathered target rows
            pltpu.VMEM((tile_r, C), jnp.float32),       # Frobenius accumulator
            pltpu.SemaphoreType.DMA((B,)),              # gather completion sems
        ],
    )

    out = pl.pallas_call(
        kernel,
        out_shape=jax.ShapeDtypeStruct((1,), jnp.float32),
        grid_spec=grid_spec,
        compiler_params=pltpu.CompilerParams(
            dimension_semantics=("arbitrary",),       # scalar reduction axis
            vmem_limit_bytes=32 * 1024 * 1024,        # headroom for 2 MiB blocks
        ),
        cost_estimate=cost,
    )(target.astype(jnp.int32), x, distance_matrix,
      distance_matrix_initial, distance_matrix)
    return out[0]


def _reference(x, target, dist, dist0):
    sdv = dist[target]                                  # (B, C) gathered rows
    log_sm = jax.nn.log_softmax(x, axis=1)
    reg = -jnp.sum(sdv * log_sm) / x.shape[0] / 10.0
    return reg + 0.5 * jnp.sum((dist - dist0) ** 2)


def _make_inputs(key, B, C):
    k_x, k_t, k_d, k_p = jax.random.split(key, 4)
    x = jax.random.normal(k_x, (B, C), dtype=jnp.float32)
    target = jax.random.randint(k_t, (B,), 0, C, dtype=jnp.int32)
    # TODO(synk): utils2.calculate_wordnet_distance has no JAX equivalent;
    # a synthetic symmetric zero-diagonal distance matrix stands in for it.
    w = jax.random.uniform(k_d, (C, C), dtype=jnp.float32)
    dist_initial = 0.5 * (w + w.T) * (1.0 - jnp.eye(C, dtype=jnp.float32))
    dist = dist_initial + 0.01 * jax.random.normal(k_p, (C, C), dtype=jnp.float32)
    return x, target, dist, dist_initial


if __name__ == "__main__":
    key = jax.random.PRNGKey(0)
    k_small, k_big, k_tail = jax.random.split(key, 3)

    # Small shape consistent with the module (single row block, grid=(1,)).
    x, tgt, d, d0 = _make_inputs(k_small, B=8, C=16)
    out = inclusive_loss(x, tgt, d, d0)
    jax.block_until_ready(out)
    ref = _reference(x, tgt, d, d0)
    assert jnp.allclose(out, ref, rtol=1e-3, atol=1e-3), (out, ref)

    # Larger C exercises the streamed row-block path (tile_r=512, grid=(2,)).
    x2, tgt2, d2, d02 = _make_inputs(k_big, B=8, C=1024)
    out2 = inclusive_loss(x2, tgt2, d2, d02)
    jax.block_until_ready(out2)
    ref2 = _reference(x2, tgt2, d2, d02)
    assert jnp.allclose(out2, ref2, rtol=1e-3, atol=1e-3), (out2, ref2)

    # Non-divisible C exercises the padded-tail mask (tile_r=520, grid=(2,)).
    x3, tgt3, d3, d03 = _make_inputs(k_tail, B=8, C=1000)
    out3 = inclusive_loss(x3, tgt3, d3, d03)
    jax.block_until_ready(out3)
    ref3 = _reference(x3, tgt3, d3, d03)
    assert jnp.allclose(out3, ref3, rtol=1e-3, atol=1e-3), (out3, ref3)

    print("KERNEL_OK")
</pallas_src>

<mosaic_0001>
module attributes {stable_mosaic.version = 11 : i64} {
  func.func @kernel(%arg0: i32, %arg1: memref<8xi32, #tpu.memory_space<smem>>, %arg2: memref<8x16xf32, #tpu.memory_space<vmem>>, %arg3: memref<16x16xf32, #tpu.memory_space<vmem>>, %arg4: memref<16x16xf32, #tpu.memory_space<vmem>>, %arg5: memref<16x16xf32, #tpu.memory_space<any>>, %arg6: memref<1xf32, #tpu.memory_space<smem>>, %arg7: memref<8x16xf32, #tpu.memory_space<vmem>>, %arg8: memref<16x16xf32, #tpu.memory_space<vmem>>, %arg9: memref<8x!tpu.dma_semaphore, #tpu.memory_space<semaphore_mem>>) attributes {dimension_semantics = [#tpu.dimension_semantics<arbitrary>], iteration_bounds = array<i64: 1>, scalar_prefetch = 1 : i64, scratch_operands = 3 : i64, tpu.core_type = #tpu.core_type<tc>, window_params = [{pipeline_mode = #tpu.pipeline_mode<synchronous>, transform_indices = @transform_0, window_bounds = array<i64: 8, 16>}, {transform_indices = @transform_1, window_bounds = array<i64: 16, 16>}, {transform_indices = @transform_2, window_bounds = array<i64: 16, 16>}, {}, {transform_indices = @transform_4, window_bounds = array<i64: 1>}]} {
    %c0_i32 = arith.constant 0 : i32
    %0 = arith.cmpi eq, %arg0, %c0_i32 : i32
    %1 = arith.extui %0 : i1 to i32
    %c0_i32_0 = arith.constant 0 : i32
    %2 = arith.cmpi ne, %1, %c0_i32_0 : i32
    scf.if %2 {
      %cst = arith.constant 0.000000e+00 : f32
      %13 = vector.broadcast %cst : f32 to vector<16x16xf32>
      %c0_10 = arith.constant 0 : index
      %c0_11 = arith.constant 0 : index
      %14 = vector.load %arg8[%c0_10, %c0_11] : memref<16x16xf32, #tpu.memory_space<vmem>>, vector<16x16xf32>
      tpu.vector_store %arg8[%c0_10, %c0_11], %13 {strides = array<i32>} : memref<16x16xf32, #tpu.memory_space<vmem>>, vector<16x16xf32>,
      %c0_12 = arith.constant 0 : index
      %15 = memref.load %arg1[%c0_12] : memref<8xi32, #tpu.memory_space<smem>>
      %c0_i32_13 = arith.constant 0 : i32
      %c15_i32 = arith.constant 15 : i32
      %16 = arith.maxsi %c0_i32_13, %15 : i32
      %17 = arith.minsi %c15_i32, %16 : i32
      %c0_i32_14 = arith.constant 0 : i32
      %c0_i32_15 = arith.constant 0 : i32
      %18 = tpu.memref_slice %arg5[%17, %c0_i32_15] : memref<16x16xf32, #tpu.memory_space<any>> -> memref<1x16xf32, #tpu.memory_space<any>>
      %c0_i32_16 = arith.constant 0 : i32
      %c0_i32_17 = arith.constant 0 : i32
      %19 = tpu.memref_slice %arg7[%c0_i32_16, %c0_i32_17] : memref<8x16xf32, #tpu.memory_space<vmem>> -> memref<1x16xf32, #tpu.memory_space<vmem>>
      %20 = tpu.memref_slice %arg9[%c0_i32_14] : memref<8x!tpu.dma_semaphore, #tpu.memory_space<semaphore_mem>> -> memref<1x!tpu.dma_semaphore, #tpu.memory_space<semaphore_mem>>
      %21 = tpu.memref_squeeze %20 : memref<1x!tpu.dma_semaphore, #tpu.memory_space<semaphore_mem>> -> memref<!tpu.dma_semaphore, #tpu.memory_space<semaphore_mem>>
      tpu.enqueue_dma source(%18 : memref<1x16xf32, #tpu.memory_space<any>>) target(%19 : memref<1x16xf32, #tpu.memory_space<vmem>>) target_semaphore(%21 : memref<!tpu.dma_semaphore, #tpu.memory_space<semaphore_mem>>)
      %c1 = arith.constant 1 : index
      %22 = memref.load %arg1[%c1] : memref<8xi32, #tpu.memory_space<smem>>
      %c0_i32_18 = arith.constant 0 : i32
      %c15_i32_19 = arith.constant 15 : i32
      %23 = arith.maxsi %c0_i32_18, %22 : i32
      %24 = arith.minsi %c15_i32_19, %23 : i32
      %c1_i32 = arith.constant 1 : i32
      %c0_i32_20 = arith.constant 0 : i32
      %25 = tpu.memref_slice %arg5[%24, %c0_i32_20] : memref<16x16xf32, #tpu.memory_space<any>> -> memref<1x16xf32, #tpu.memory_space<any>>
      %c1_i32_21 = arith.constant 1 : i32
      %c0_i32_22 = arith.constant 0 : i32
      %26 = tpu.memref_slice %arg7[%c1_i32_21, %c0_i32_22] : memref<8x16xf32, #tpu.memory_space<vmem>> -> memref<1x16xf32, #tpu.memory_space<vmem>>
      %27 = tpu.memref_slice %arg9[%c1_i32] : memref<8x!tpu.dma_semaphore, #tpu.memory_space<semaphore_mem>> -> memref<1x!tpu.dma_semaphore, #tpu.memory_space<semaphore_mem>>
      %28 = tpu.memref_squeeze %27 : memref<1x!tpu.dma_semaphore, #tpu.memory_space<semaphore_mem>> -> memref<!tpu.dma_semaphore, #tpu.memory_space<semaphore_mem>>
      tpu.enqueue_dma source(%25 : memref<1x16xf32, #tpu.memory_space<any>>) target(%26 : memref<1x16xf32, #tpu.memory_space<vmem>>) target_semaphore(%28 : memref<!tpu.dma_semaphore, #tpu.memory_space<semaphore_mem>>)
      %c2 = arith.constant 2 : index
      %29 = memref.load %arg1[%c2] : memref<8xi32, #tpu.memory_space<smem>>
      %c0_i32_23 = arith.constant 0 : i32
      %c15_i32_24 = arith.constant 15 : i32
      %30 = arith.maxsi %c0_i32_23, %29 : i32
      %31 = arith.minsi %c15_i32_24, %30 : i32
      %c2_i32 = arith.constant 2 : i32
      %c0_i32_25 = arith.constant 0 : i32
      %32 = tpu.memref_slice %arg5[%31, %c0_i32_25] : memref<16x16xf32, #tpu.memory_space<any>> -> memref<1x16xf32, #tpu.memory_space<any>>
      %c2_i32_26 = arith.constant 2 : i32
      %c0_i32_27 = arith.constant 0 : i32
      %33 = tpu.memref_slice %arg7[%c2_i32_26, %c0_i32_27] : memref<8x16xf32, #tpu.memory_space<vmem>> -> memref<1x16xf32, #tpu.memory_space<vmem>>
      %34 = tpu.memref_slice %arg9[%c2_i32] : memref<8x!tpu.dma_semaphore, #tpu.memory_space<semaphore_mem>> -> memref<1x!tpu.dma_semaphore, #tpu.memory_space<semaphore_mem>>
      %35 = tpu.memref_squeeze %34 : memref<1x!tpu.dma_semaphore, #tpu.memory_space<semaphore_mem>> -> memref<!tpu.dma_semaphore, #tpu.memory_space<semaphore_mem>>
      tpu.enqueue_dma source(%32 : memref<1x16xf32, #tpu.memory_space<any>>) target(%33 : memref<1x16xf32, #tpu.memory_space<vmem>>) target_semaphore(%35 : memref<!tpu.dma_semaphore, #tpu.memory_space<semaphore_mem>>)
      %c3 = arith.constant 3 : index
      %36 = memref.load %arg1[%c3] : memref<8xi32, #tpu.memory_space<smem>>
      %c0_i32_28 = arith.constant 0 : i32
      %c15_i32_29 = arith.constant 15 : i32
      %37 = arith.maxsi %c0_i32_28, %36 : i32
      %38 = arith.minsi %c15_i32_29, %37 : i32
      %c3_i32 = arith.constant 3 : i32
      %c0_i32_30 = arith.constant 0 : i32
      %39 = tpu.memref_slice %arg5[%38, %c0_i32_30] : memref<16x16xf32, #tpu.memory_space<any>> -> memref<1x16xf32, #tpu.memory_space<any>>
      %c3_i32_31 = arith.constant 3 : i32
      %c0_i32_32 = arith.constant 0 : i32
      %40 = tpu.memref_slice %arg7[%c3_i32_31, %c0_i32_32] : memref<8x16xf32, #tpu.memory_space<vmem>> -> memref<1x16xf32, #tpu.memory_space<vmem>>
      %41 = tpu.memref_slice %arg9[%c3_i32] : memref<8x!tpu.dma_semaphore, #tpu.memory_space<semaphore_mem>> -> memref<1x!tpu.dma_semaphore, #tpu.memory_space<semaphore_mem>>
      %42 = tpu.memref_squeeze %41 : memref<1x!tpu.dma_semaphore, #tpu.memory_space<semaphore_mem>> -> memref<!tpu.dma_semaphore, #tpu.memory_space<semaphore_mem>>
      tpu.enqueue_dma source(%39 : memref<1x16xf32, #tpu.memory_space<any>>) target(%40 : memref<1x16xf32, #tpu.memory_space<vmem>>) target_semaphore(%42 : memref<!tpu.dma_semaphore, #tpu.memory_space<semaphore_mem>>)
      %c4 = arith.constant 4 : index
      %43 = memref.load %arg1[%c4] : memref<8xi32, #tpu.memory_space<smem>>
      %c0_i32_33 = arith.constant 0 : i32
      %c15_i32_34 = arith.constant 15 : i32
      %44 = arith.maxsi %c0_i32_33, %43 : i32
      %45 = arith.minsi %c15_i32_34, %44 : i32
      %c4_i32 = arith.constant 4 : i32
      %c0_i32_35 = arith.constant 0 : i32
      %46 = tpu.memref_slice %arg5[%45, %c0_i32_35] : memref<16x16xf32, #tpu.memory_space<any>> -> memref<1x16xf32, #tpu.memory_space<any>>
      %c4_i32_36 = arith.constant 4 : i32
      %c0_i32_37 = arith.constant 0 : i32
      %47 = tpu.memref_slice %arg7[%c4_i32_36, %c0_i32_37] : memref<8x16xf32, #tpu.memory_space<vmem>> -> memref<1x16xf32, #tpu.memory_space<vmem>>
      %48 = tpu.memref_slice %arg9[%c4_i32] : memref<8x!tpu.dma_semaphore, #tpu.memory_space<semaphore_mem>> -> memref<1x!tpu.dma_semaphore, #tpu.memory_space<semaphore_mem>>
      %49 = tpu.memref_squeeze %48 : memref<1x!tpu.dma_semaphore, #tpu.memory_space<semaphore_mem>> -> memref<!tpu.dma_semaphore, #tpu.memory_space<semaphore_mem>>
      tpu.enqueue_dma source(%46 : memref<1x16xf32, #tpu.memory_space<any>>) target(%47 : memref<1x16xf32, #tpu.memory_space<vmem>>) target_semaphore(%49 : memref<!tpu.dma_semaphore, #tpu.memory_space<semaphore_mem>>)
      %c5 = arith.constant 5 : index
      %50 = memref.load %arg1[%c5] : memref<8xi32, #tpu.memory_space<smem>>
      %c0_i32_38 = arith.constant 0 : i32
      %c15_i32_39 = arith.constant 15 : i32
      %51 = arith.maxsi %c0_i32_38, %50 : i32
      %52 = arith.minsi %c15_i32_39, %51 : i32
      %c5_i32 = arith.constant 5 : i32
      %c0_i32_40 = arith.constant 0 : i32
      %53 = tpu.memref_slice %arg5[%52, %c0_i32_40] : memref<16x16xf32, #tpu.memory_space<any>> -> memref<1x16xf32, #tpu.memory_space<any>>
      %c5_i32_41 = arith.constant 5 : i32
      %c0_i32_42 = arith.constant 0 : i32
      %54 = tpu.memref_slice %arg7[%c5_i32_41, %c0_i32_42] : memref<8x16xf32, #tpu.memory_space<vmem>> -> memref<1x16xf32, #tpu.memory_space<vmem>>
      %55 = tpu.memref_slice %arg9[%c5_i32] : memref<8x!tpu.dma_semaphore, #tpu.memory_space<semaphore_mem>> -> memref<1x!tpu.dma_semaphore, #tpu.memory_space<semaphore_mem>>
      %56 = tpu.memref_squeeze %55 : memref<1x!tpu.dma_semaphore, #tpu.memory_space<semaphore_mem>> -> memref<!tpu.dma_semaphore, #tpu.memory_space<semaphore_mem>>
      tpu.enqueue_dma source(%53 : memref<1x16xf32, #tpu.memory_space<any>>) target(%54 : memref<1x16xf32, #tpu.memory_space<vmem>>) target_semaphore(%56 : memref<!tpu.dma_semaphore, #tpu.memory_space<semaphore_mem>>)
      %c6 = arith.constant 6 : index
      %57 = memref.load %arg1[%c6] : memref<8xi32, #tpu.memory_space<smem>>
      %c0_i32_43 = arith.constant 0 : i32
      %c15_i32_44 = arith.constant 15 : i32
      %58 = arith.maxsi %c0_i32_43, %57 : i32
      %59 = arith.minsi %c15_i32_44, %58 : i32
      %c6_i32 = arith.constant 6 : i32
      %c0_i32_45 = arith.constant 0 : i32
      %60 = tpu.memref_slice %arg5[%59, %c0_i32_45] : memref<16x16xf32, #tpu.memory_space<any>> -> memref<1x16xf32, #tpu.memory_space<any>>
      %c6_i32_46 = arith.constant 6 : i32
      %c0_i32_47 = arith.constant 0 : i32
      %61 = tpu.memref_slice %arg7[%c6_i32_46, %c0_i32_47] : memref<8x16xf32, #tpu.memory_space<vmem>> -> memref<1x16xf32, #tpu.memory_space<vmem>>
      %62 = tpu.memref_slice %arg9[%c6_i32] : memref<8x!tpu.dma_semaphore, #tpu.memory_space<semaphore_mem>> -> memref<1x!tpu.dma_semaphore, #tpu.memory_space<semaphore_mem>>
      %63 = tpu.memref_squeeze %62 : memref<1x!tpu.dma_semaphore, #tpu.memory_space<semaphore_mem>> -> memref<!tpu.dma_semaphore, #tpu.memory_space<semaphore_mem>>
      tpu.enqueue_dma source(%60 : memref<1x16xf32, #tpu.memory_space<any>>) target(%61 : memref<1x16xf32, #tpu.memory_space<vmem>>) target_semaphore(%63 : memref<!tpu.dma_semaphore, #tpu.memory_space<semaphore_mem>>)
      %c7 = arith.constant 7 : index
      %64 = memref.load %arg1[%c7] : memref<8xi32, #tpu.memory_space<smem>>
      %c0_i32_48 = arith.constant 0 : i32
      %c15_i32_49 = arith.constant 15 : i32
      %65 = arith.maxsi %c0_i32_48, %64 : i32
      %66 = arith.minsi %c15_i32_49, %65 : i32
      %c7_i32 = arith.constant 7 : i32
      %c0_i32_50 = arith.constant 0 : i32
      %67 = tpu.memref_slice %arg5[%66, %c0_i32_50] : memref<16x16xf32, #tpu.memory_space<any>> -> memref<1x16xf32, #tpu.memory_space<any>>
      %c7_i32_51 = arith.constant 7 : i32
      %c0_i32_52 = arith.constant 0 : i32
      %68 = tpu.memref_slice %arg7[%c7_i32_51, %c0_i32_52] : memref<8x16xf32, #tpu.memory_space<vmem>> -> memref<1x16xf32, #tpu.memory_space<vmem>>
      %69 = tpu.memref_slice %arg9[%c7_i32] : memref<8x!tpu.dma_semaphore, #tpu.memory_space<semaphore_mem>> -> memref<1x!tpu.dma_semaphore, #tpu.memory_space<semaphore_mem>>
      %70 = tpu.memref_squeeze %69 : memref<1x!tpu.dma_semaphore, #tpu.memory_space<semaphore_mem>> -> memref<!tpu.dma_semaphore, #tpu.memory_space<semaphore_mem>>
      tpu.enqueue_dma source(%67 : memref<1x16xf32, #tpu.memory_space<any>>) target(%68 : memref<1x16xf32, #tpu.memory_space<vmem>>) target_semaphore(%70 : memref<!tpu.dma_semaphore, #tpu.memory_space<semaphore_mem>>)
    } else {
    }
    %c0 = arith.constant 0 : index
    %c0_1 = arith.constant 0 : index
    %3 = vector.load %arg3[%c0, %c0_1] : memref<16x16xf32, #tpu.memory_space<vmem>>, vector<16x16xf32>
    %c0_2 = arith.constant 0 : index
    %c0_3 = arith.constant 0 : index
    %4 = vector.load %arg4[%c0_2, %c0_3] : memref<16x16xf32, #tpu.memory_space<vmem>>, vector<16x16xf32>
    %5 = arith.subf %3, %4 : vector<16x16xf32>
    %c0_4 = arith.constant 0 : index
    %c0_5 = arith.constant 0 : index
    %6 = vector.load %arg8[%c0_4, %c0_5] : memref<16x16xf32, #tpu.memory_space<vmem>>, vector<16x16xf32>
    %7 = arith.mulf %5, %5 : vector<16x16xf32>
    %8 = arith.addf %6, %7 : vector<16x16xf32>
    %c0_6 = arith.constant 0 : index
    %c0_7 = arith.constant 0 : index
    %9 = vector.load %arg8[%c0_6, %c0_7] : memref<16x16xf32, #tpu.memory_space<vmem>>, vector<16x16xf32>
    tpu.vector_store %arg8[%c0_6, %c0_7], %8 {strides = array<i32>} : memref<16x16xf32, #tpu.memory_space<vmem>>, vector<16x16xf32>,
    %c0_i32_8 = arith.constant 0 : i32
    %10 = arith.cmpi eq, %arg0, %c0_i32_8 : i32
    %11 = arith.extui %10 : i1 to i32
    %c0_i32_9 = arith.constant 0 : i32
    %12 = arith.cmpi ne, %11, %c0_i32_9 : i32
    scf.if %12 {
      %c0_i32_10 = arith.constant 0 : i32
      %c0_i32_11 = arith.constant 0 : i32
      %c0_i32_12 = arith.constant 0 : i32
      %13 = tpu.memref_slice %arg5[%c0_i32_11, %c0_i32_12] : memref<16x16xf32, #tpu.memory_space<any>> -> memref<1x16xf32, #tpu.memory_space<any>>
      %c0_i32_13 = arith.constant 0 : i32
      %c0_i32_14 = arith.constant 0 : i32
      %14 = tpu.memref_slice %arg7[%c0_i32_13, %c0_i32_14] : memref<8x16xf32, #tpu.memory_space<vmem>> -> memref<1x16xf32, #tpu.memory_space<vmem>>
      %15 = tpu.memref_slice %arg9[%c0_i32_10] : memref<8x!tpu.dma_semaphore, #tpu.memory_space<semaphore_mem>> -> memref<1x!tpu.dma_semaphore, #tpu.memory_space<semaphore_mem>>
      %16 = tpu.memref_squeeze %15 : memref<1x!tpu.dma_semaphore, #tpu.memory_space<semaphore_mem>> -> memref<!tpu.dma_semaphore, #tpu.memory_space<semaphore_mem>>
      tpu.wait_dma2 semaphore(%16 : memref<!tpu.dma_semaphore, #tpu.memory_space<semaphore_mem>>) src(%13 : memref<1x16xf32, #tpu.memory_space<any>>) dst(%14 : memref<1x16xf32, #tpu.memory_space<vmem>>)
      %c1_i32 = arith.constant 1 : i32
      %c0_i32_15 = arith.constant 0 : i32
      %c0_i32_16 = arith.constant 0 : i32
      %17 = tpu.memref_slice %arg5[%c0_i32_15, %c0_i32_16] : memref<16x16xf32, #tpu.memory_space<any>> -> memref<1x16xf32, #tpu.memory_space<any>>
      %c1_i32_17 = arith.constant 1 : i32
      %c0_i32_18 = arith.constant 0 : i32
      %18 = tpu.memref_slice %arg7[%c1_i32_17, %c0_i32_18] : memref<8x16xf32, #tpu.memory_space<vmem>> -> memref<1x16xf32, #tpu.memory_space<vmem>>
      %19 = tpu.memref_slice %arg9[%c1_i32] : memref<8x!tpu.dma_semaphore, #tpu.memory_space<semaphore_mem>> -> memref<1x!tpu.dma_semaphore, #tpu.memory_space<semaphore_mem>>
      %20 = tpu.memref_squeeze %19 : memref<1x!tpu.dma_semaphore, #tpu.memory_space<semaphore_mem>> -> memref<!tpu.dma_semaphore, #tpu.memory_space<semaphore_mem>>
      tpu.wait_dma2 semaphore(%20 : memref<!tpu.dma_semaphore, #tpu.memory_space<semaphore_mem>>) src(%17 : memref<1x16xf32, #tpu.memory_space<any>>) dst(%18 : memref<1x16xf32, #tpu.memory_space<vmem>>)
      %c2_i32 = arith.constant 2 : i32
      %c0_i32_19 = arith.constant 0 : i32
      %c0_i32_20 = arith.constant 0 : i32
      %21 = tpu.memref_slice %arg5[%c0_i32_19, %c0_i32_20] : memref<16x16xf32, #tpu.memory_space<any>> -> memref<1x16xf32, #tpu.memory_space<any>>
      %c2_i32_21 = arith.constant 2 : i32
      %c0_i32_22 = arith.constant 0 : i32
      %22 = tpu.memref_slice %arg7[%c2_i32_21, %c0_i32_22] : memref<8x16xf32, #tpu.memory_space<vmem>> -> memref<1x16xf32, #tpu.memory_space<vmem>>
      %23 = tpu.memref_slice %arg9[%c2_i32] : memref<8x!tpu.dma_semaphore, #tpu.memory_space<semaphore_mem>> -> memref<1x!tpu.dma_semaphore, #tpu.memory_space<semaphore_mem>>
      %24 = tpu.memref_squeeze %23 : memref<1x!tpu.dma_semaphore, #tpu.memory_space<semaphore_mem>> -> memref<!tpu.dma_semaphore, #tpu.memory_space<semaphore_mem>>
      tpu.wait_dma2 semaphore(%24 : memref<!tpu.dma_semaphore, #tpu.memory_space<semaphore_mem>>) src(%21 : memref<1x16xf32, #tpu.memory_space<any>>) dst(%22 : memref<1x16xf32, #tpu.memory_space<vmem>>)
      %c3_i32 = arith.constant 3 : i32
      %c0_i32_23 = arith.constant 0 : i32
      %c0_i32_24 = arith.constant 0 : i32
      %25 = tpu.memref_slice %arg5[%c0_i32_23, %c0_i32_24] : memref<16x16xf32, #tpu.memory_space<any>> -> memref<1x16xf32, #tpu.memory_space<any>>
      %c3_i32_25 = arith.constant 3 : i32
      %c0_i32_26 = arith.constant 0 : i32
      %26 = tpu.memref_slice %arg7[%c3_i32_25, %c0_i32_26] : memref<8x16xf32, #tpu.memory_space<vmem>> -> memref<1x16xf32, #tpu.memory_space<vmem>>
      %27 = tpu.memref_slice %arg9[%c3_i32] : memref<8x!tpu.dma_semaphore, #tpu.memory_space<semaphore_mem>> -> memref<1x!tpu.dma_semaphore, #tpu.memory_space<semaphore_mem>>
      %28 = tpu.memref_squeeze %27 : memref<1x!tpu.dma_semaphore, #tpu.memory_space<semaphore_mem>> -> memref<!tpu.dma_semaphore, #tpu.memory_space<semaphore_mem>>
      tpu.wait_dma2 semaphore(%28 : memref<!tpu.dma_semaphore, #tpu.memory_space<semaphore_mem>>) src(%25 : memref<1x16xf32, #tpu.memory_space<any>>) dst(%26 : memref<1x16xf32, #tpu.memory_space<vmem>>)
      %c4_i32 = arith.constant 4 : i32
      %c0_i32_27 = arith.constant 0 : i32
      %c0_i32_28 = arith.constant 0 : i32
      %29 = tpu.memref_slice %arg5[%c0_i32_27, %c0_i32_28] : memref<16x16xf32, #tpu.memory_space<any>> -> memref<1x16xf32, #tpu.memory_space<any>>
      %c4_i32_29 = arith.constant 4 : i32
      %c0_i32_30 = arith.constant 0 : i32
      %30 = tpu.memref_slice %arg7[%c4_i32_29, %c0_i32_30] : memref<8x16xf32, #tpu.memory_space<vmem>> -> memref<1x16xf32, #tpu.memory_space<vmem>>
      %31 = tpu.memref_slice %arg9[%c4_i32] : memref<8x!tpu.dma_semaphore, #tpu.memory_space<semaphore_mem>> -> memref<1x!tpu.dma_semaphore, #tpu.memory_space<semaphore_mem>>
      %32 = tpu.memref_squeeze %31 : memref<1x!tpu.dma_semaphore, #tpu.memory_space<semaphore_mem>> -> memref<!tpu.dma_semaphore, #tpu.memory_space<semaphore_mem>>
      tpu.wait_dma2 semaphore(%32 : memref<!tpu.dma_semaphore, #tpu.memory_space<semaphore_mem>>) src(%29 : memref<1x16xf32, #tpu.memory_space<any>>) dst(%30 : memref<1x16xf32, #tpu.memory_space<vmem>>)
      %c5_i32 = arith.constant 5 : i32
      %c0_i32_31 = arith.constant 0 : i32
      %c0_i32_32 = arith.constant 0 : i32
      %33 = tpu.memref_slice %arg5[%c0_i32_31, %c0_i32_32] : memref<16x16xf32, #tpu.memory_space<any>> -> memref<1x16xf32, #tpu.memory_space<any>>
      %c5_i32_33 = arith.constant 5 : i32
      %c0_i32_34 = arith.constant 0 : i32
      %34 = tpu.memref_slice %arg7[%c5_i32_33, %c0_i32_34] : memref<8x16xf32, #tpu.memory_space<vmem>> -> memref<1x16xf32, #tpu.memory_space<vmem>>
      %35 = tpu.memref_slice %arg9[%c5_i32] : memref<8x!tpu.dma_semaphore, #tpu.memory_space<semaphore_mem>> -> memref<1x!tpu.dma_semaphore, #tpu.memory_space<semaphore_mem>>
      %36 = tpu.memref_squeeze %35 : memref<1x!tpu.dma_semaphore, #tpu.memory_space<semaphore_mem>> -> memref<!tpu.dma_semaphore, #tpu.memory_space<semaphore_mem>>
      tpu.wait_dma2 semaphore(%36 : memref<!tpu.dma_semaphore, #tpu.memory_space<semaphore_mem>>) src(%33 : memref<1x16xf32, #tpu.memory_space<any>>) dst(%34 : memref<1x16xf32, #tpu.memory_space<vmem>>)
      %c6_i32 = arith.constant 6 : i32
      %c0_i32_35 = arith.constant 0 : i32
      %c0_i32_36 = arith.constant 0 : i32
      %37 = tpu.memref_slice %arg5[%c0_i32_35, %c0_i32_36] : memref<16x16xf32, #tpu.memory_space<any>> -> memref<1x16xf32, #tpu.memory_space<any>>
      %c6_i32_37 = arith.constant 6 : i32
      %c0_i32_38 = arith.constant 0 : i32
      %38 = tpu.memref_slice %arg7[%c6_i32_37, %c0_i32_38] : memref<8x16xf32, #tpu.memory_space<vmem>> -> memref<1x16xf32, #tpu.memory_space<vmem>>
      %39 = tpu.memref_slice %arg9[%c6_i32] : memref<8x!tpu.dma_semaphore, #tpu.memory_space<semaphore_mem>> -> memref<1x!tpu.dma_semaphore, #tpu.memory_space<semaphore_mem>>
      %40 = tpu.memref_squeeze %39 : memref<1x!tpu.dma_semaphore, #tpu.memory_space<semaphore_mem>> -> memref<!tpu.dma_semaphore, #tpu.memory_space<semaphore_mem>>
      tpu.wait_dma2 semaphore(%40 : memref<!tpu.dma_semaphore, #tpu.memory_space<semaphore_mem>>) src(%37 : memref<1x16xf32, #tpu.memory_space<any>>) dst(%38 : memref<1x16xf32, #tpu.memory_space<vmem>>)
      %c7_i32 = arith.constant 7 : i32
      %c0_i32_39 = arith.constant 0 : i32
      %c0_i32_40 = arith.constant 0 : i32
      %41 = tpu.memref_slice %arg5[%c0_i32_39, %c0_i32_40] : memref<16x16xf32, #tpu.memory_space<any>> -> memref<1x16xf32, #tpu.memory_space<any>>
      %c7_i32_41 = arith.constant 7 : i32
      %c0_i32_42 = arith.constant 0 : i32
      %42 = tpu.memref_slice %arg7[%c7_i32_41, %c0_i32_42] : memref<8x16xf32, #tpu.memory_space<vmem>> -> memref<1x16xf32, #tpu.memory_space<vmem>>
      %43 = tpu.memref_slice %arg9[%c7_i32] : memref<8x!tpu.dma_semaphore, #tpu.memory_space<semaphore_mem>> -> memref<1x!tpu.dma_semaphore, #tpu.memory_space<semaphore_mem>>
      %44 = tpu.memref_squeeze %43 : memref<1x!tpu.dma_semaphore, #tpu.memory_space<semaphore_mem>> -> memref<!tpu.dma_semaphore, #tpu.memory_space<semaphore_mem>>
      tpu.wait_dma2 semaphore(%44 : memref<!tpu.dma_semaphore, #tpu.memory_space<semaphore_mem>>) src(%41 : memref<1x16xf32, #tpu.memory_space<any>>) dst(%42 : memref<1x16xf32, #tpu.memory_space<vmem>>)
      %c0_43 = arith.constant 0 : index
      %c0_44 = arith.constant 0 : index
      %45 = vector.load %arg2[%c0_43, %c0_44] : memref<8x16xf32, #tpu.memory_space<vmem>>, vector<8x16xf32>
      %cst = arith.constant dense<0xFF800000> : vector<8xf32>
      %46 = vector.multi_reduction <maximumf>, %45, %cst [1] : vector<8x16xf32> to vector<8xf32>
      %47 = vector.shape_cast %46 : vector<8xf32> to vector<8x1xf32>
      %48 = vector.broadcast %47 : vector<8x1xf32> to vector<8x16xf32>
      %49 = arith.subf %45, %48 : vector<8x16xf32>
      %50 = math.exp %49 : vector<8x16xf32>
      %cst_45 = arith.constant dense<0.000000e+00> : vector<8xf32>
      %51 = vector.multi_reduction <add>, %50, %cst_45 [1] : vector<8x16xf32> to vector<8xf32>
      %52 = vector.shape_cast %51 : vector<8xf32> to vector<8x1xf32>
      %53 = math.log %52 : vector<8x1xf32>
      %54 = arith.addf %53, %47 : vector<8x1xf32>
      %55 = vector.broadcast %54 : vector<8x1xf32> to vector<8x16xf32>
      %56 = arith.subf %45, %55 : vector<8x16xf32>
      %c0_46 = arith.constant 0 : index
      %c0_47 = arith.constant 0 : index
      %57 = vector.load %arg7[%c0_46, %c0_47] : memref<8x16xf32, #tpu.memory_space<vmem>>, vector<8x16xf32>
      %58 = arith.mulf %57, %56 : vector<8x16xf32>
      %59 = vector.shape_cast %58 : vector<8x16xf32> to vector<1x8x16xf32>
      %cst_48 = arith.constant dense<0.000000e+00> : vector<1xf32>
      %60 = vector.multi_reduction <add>, %59, %cst_48 [1, 2] : vector<1x8x16xf32> to vector<1xf32>
      %61 = vector.shape_cast %60 : vector<1xf32> to vector<1x1x1xf32>
      %62 = vector.extract %61[0, 0, 0] : f32 from vector<1x1x1xf32>
      %cst_49 = arith.constant 0.000000e+00 : f32
      %63 = arith.subf %cst_49, %62 : f32
      %cst_50 = arith.constant 1.250000e-02 : f32
      %64 = arith.mulf %63, %cst_50 : f32
      %c0_51 = arith.constant 0 : index
      %c0_52 = arith.constant 0 : index
      %65 = vector.load %arg8[%c0_51, %c0_52] : memref<16x16xf32, #tpu.memory_space<vmem>>, vector<16x16xf32>
      %66 = vector.shape_cast %65 : vector<16x16xf32> to vector<1x16x16xf32>
      %cst_53 = arith.constant dense<0.000000e+00> : vector<1xf32>
      %67 = vector.multi_reduction <add>, %66, %cst_53 [1, 2] : vector<1x16x16xf32> to vector<1xf32>
      %68 = vector.shape_cast %67 : vector<1xf32> to vector<1x1x1xf32>
      %69 = vector.extract %68[0, 0, 0] : f32 from vector<1x1x1xf32>
      %cst_54 = arith.constant 5.000000e-01 : f32
      %70 = arith.mulf %cst_54, %69 : f32
      %71 = arith.addf %64, %70 : f32
      %c0_55 = arith.constant 0 : index
      %72 = memref.load %arg6[%c0_55] : memref<1xf32, #tpu.memory_space<smem>>
      memref.store %71, %arg6[%c0_55] : memref<1xf32, #tpu.memory_space<smem>>
    } else {
    }
    return
  }
  func.func @transform_0(%arg0: i32, %arg1: memref<8xi32, #tpu.memory_space<smem>>) -> (i32, i32) {
    %c0_i32 = arith.constant 0 : i32
    %c0_i32_0 = arith.constant 0 : i32
    %c0_i32_1 = arith.constant 0 : i32
    return %c0_i32, %c0_i32_0 : i32, i32
  }
  func.func @transform_1(%arg0: i32, %arg1: memref<8xi32, #tpu.memory_space<smem>>) -> (i32, i32) {
    %c0_i32 = arith.constant 0 : i32
    %c0_i32_0 = arith.constant 0 : i32
    return %arg0, %c0_i32 : i32, i32
  }
  func.func @transform_2(%arg0: i32, %arg1: memref<8xi32, #tpu.memory_space<smem>>) -> (i32, i32) {
    %c0_i32 = arith.constant 0 : i32
    %c0_i32_0 = arith.constant 0 : i32
    return %arg0, %c0_i32 : i32, i32
  }
  func.func @transform_4(%arg0: i32, %arg1: memref<8xi32, #tpu.memory_space<smem>>) -> i32 {
    %c0_i32 = arith.constant 0 : i32
    %c0_i32_0 = arith.constant 0 : i32
    return %c0_i32 : i32
  }
}

</mosaic_0001>

<bundles_post_ra>
// kernel: inclusive_loss.1
= control target key start
LH: loop header
LB: loop body
LE: loop exit
PB: predicated region body
PF: predicated region fallthrough
CT: control target
= control target key end

     0   :  { %s1095_s0 = inlined_call_operand.vmem [shape: s32[8], index: 0, kind: input, shape index: {}]   ;;  %s1096_s1 = inlined_call_operand.hbm [shape: f32[8,16], index: 1, kind: input, shape index: {}]   ;;  %s1097_s2 = inlined_call_operand.hbm [shape: f32[16,16], index: 2, kind: input, shape index: {}, may-alias: {2,4}]   ;;  %s1098_s3 = inlined_call_operand.hbm [shape: f32[16,16], index: 3, kind: input, shape index: {}]   ;;  %s1099_s4 = inlined_call_operand.hbm [shape: f32[16,16], index: 4, kind: input, shape index: {}, may-alias: {2,4}]   ;;  %s1100_s5 = inlined_call_operand.hbm [shape: f32[1], index: 5, kind: output, shape index: {}]  }
   0x1   :  { %s10_s20 = sshll.u32 %s1095_s0, 4  ;;  %s11_s20 = int_to_ptr.vmem [resolvable:$true] %s10_s20 }
   0x2   :  { %s504_s21 = scalar_lea.vmem %s11_s20, 16  ;;  %p509_p1 = scmp.lt.s32.totalorder %s11_s20, %s11_s20 }
   0x3   :  { %p505_p0 = scmp.ne.s32.totalorder %s11_s20, %s504_s21  ;;  %p510_p2 = scmp.lt.s32.totalorder %s504_s21, %s504_s21 }
   0x5   :  { %p511_p3 = por %p510_p2, %p509_p1 }
   0x7   :  { %p512_p4 = pnand %p511_p3, %p505_p0 }
   0x9   :  { %515 = shalt.err (!%p512_p4)  }
   0xa   :  { %s808_s22 = smov [#allocation6]  }
   0xb   :  { %13 = dma.vmem_to_smem %s11_s20, 16, %s808_s22, [#allocation5] }
   0xc   :  { %784 = dma.done.wait [#allocation5], 16 }
   0xd   :  { %785 = vsyncadd [#allocation5], 4294967280 }
   0xe   :  { %15 = sfence }
   0xf   :  { %16 = vsyncpa [#allocation8], 0 }
  0x10   :  { %17 = vsyncpa [#allocation11], 0 }
  0x11   :  { %18 = vsyncpa [#allocation9], 0  ;;  %s809_s23 = smov [#allocation10]   ;;  %s516_s26 = scalar_lea.hbm %s1097_s2, 256 }
  0x12   :  { %s34_s24 = sshll.u32 %s809_s23, 4  ;;  %p517_p5 = scmp.ne.s32.totalorder %s1097_s2, %s516_s26  ;;  %s35_s24 = int_to_ptr.vmem [resolvable:$true] %s34_s24 }
  0x13   :  { %p520_p6 = scmp.lt.u32.totalorder %s516_s26, %s1097_s2 }
  0x15   :  { %p522_p7 = pnand %p520_p6, %p517_p5 }
  0x17   :  { %525 = shalt.err (!%p522_p7)
}
  0x18   :  { %s526_s6 = scalar_lea.vmem %s35_s24, 256  ;;  %p531_p9 = scmp.lt.s32.totalorder %s35_s24, %s35_s24 }
  0x19   :  { %p527_p8 = scmp.ne.s32.totalorder %s35_s24, %s526_s6  ;;  %p532_p10 = scmp.lt.s32.totalorder %s526_s6, %s526_s6 }
  0x1b   :  { %p533_p11 = por %p532_p10, %p531_p9 }
  0x1d   :  { %p534_p12 = pnand %p533_p11, %p527_p8 }
  0x1f   :  { %537 = shalt.err (!%p534_p12)
}
  0x20   :  { %s810_s7 = smov 128   ;;  %s811_s8 = smov 8  }
  0x21   :  { %40 = dma.hbm_to_vmem [thread:$0]  %s1097_s2, 256, %s35_s24, [#allocation11], %s810_s7, %s810_s7, %s811_s8  }
  0x22   :  { %s812_s11 = smov [#allocation7]   ;;  %s813_s13 = smov [#allocation12]  }
  0x23   :  { %s25_s12 = sshll.u32 %s812_s11, 4  ;;  %s46_s14 = sshll.u32 %s813_s13, 4  ;;  %s26_s12 = int_to_ptr.vmem [resolvable:$true] %s25_s12  ;;  %s47_s14 = int_to_ptr.vmem [resolvable:$true] %s46_s14 }
  0x24   :  { %s538_s17 = scalar_lea.hbm %s1096_s1, 128 }
  0x25   :  { %p539_p13 = scmp.ne.s32.totalorder %s1096_s1, %s538_s17  ;;  %p542_p0 = scmp.lt.u32.totalorder %s538_s17, %s1096_s1 }
  0x27   :  { %p544_p1 = pnand %p542_p0, %p539_p13 }
  0x29   :  { %547 = shalt.err (!%p544_p1)
}
  0x2a   :  { %s548_s2 = scalar_lea.vmem %s26_s12, 128  ;;  %p553_p3 = scmp.lt.s32.totalorder %s26_s12, %s26_s12 }
  0x2b   :  { %p549_p2 = scmp.ne.s32.totalorder %s26_s12, %s548_s2  ;;  %p554_p4 = scmp.lt.s32.totalorder %s548_s2, %s548_s2 }
  0x2d   :  { %p555_p5 = por %p554_p4, %p553_p3 }
  0x2f   :  { %p556_p6 = pnand %p555_p5, %p549_p2 }
  0x31   :  { %559 = shalt.err (!%p556_p6)
}
  0x32   :  { %28 = dma.hbm_to_vmem [thread:$0]  %s1096_s1, 128, %s26_s12, [#allocation8]  }
  0x33   :  { %s560_s25 = scalar_lea.hbm %s1098_s3, 256 }
  0x34   :  { %p561_p7 = scmp.ne.s32.totalorder %s1098_s3, %s560_s25  ;;  %p564_p8 = scmp.lt.u32.totalorder %s560_s25, %s1098_s3 }
  0x36   :  { %p566_p9 = pnand %p564_p8, %p561_p7 }
  0x38   :  { %569 = shalt.err (!%p566_p9)
}
  0x39   :  { %s570_s30 = scalar_lea.vmem %s47_s14, 256  ;;  %p575_p11 = scmp.lt.s32.totalorder %s47_s14, %s47_s14 }
  0x3a   :  { %p571_p10 = scmp.ne.s32.totalorder %s47_s14, %s570_s30  ;;  %p576_p12 = scmp.lt.s32.totalorder %s570_s30, %s570_s30 }
  0x3c   :  { %p577_p13 = por %p576_p12, %p575_p11 }
  0x3e   :  { %p578_p0 = pnand %p577_p13, %p571_p10 }
  0x40   :  { %581 = shalt.err (!%p578_p0)
}
  0x41   :  { %52 = dma.hbm_to_vmem [thread:$0]  %s1098_s3, 256, %s47_s14, [#allocation11], %s810_s7, %s810_s7, %s811_s8  }
  0x42   :  { %786 = dma.done.wait [#allocation8], 128  }
  0x43   :  { %787 = vsyncadd [#allocation8], 4294967168 }
  0x44   :  { %788 = dma.done.wait [#allocation11], 512  }
  0x45   :  { %789 = vsyncadd [#allocation11], 4294966784  ;;  %vm66_vm0 = vcmask 130048   ;;  %v814_v0 = vmov 0.0   ;;  %s69_s9 = sld [smem:[#allocation6]]  ;;  %s815_s10 = smov [#allocation2]  }
  0x46   :  { %67 = vst.msk [vmem:[#allocation3] sm:$0xff] %vm66_vm0, %v814_v0  ;;  %68 = vst.msk [vmem:[#allocation3 + $0x8] sm:$0xff] %vm66_vm0, %v814_v0  ;;  %s83_s11 = sshll.u32 %s815_s10, 4  ;;  %s407_s12 = sld [smem:[#allocation6 + $0x1]]  ;;  %v227_v1 = vld [vmem:[#allocation10] sm:$0xff]  ;;  %v229_v2 = vld [vmem:[#allocation12] sm:$0xff]  ;;  %s901_s11 = int_to_ptr.vmem [resolvable:$true] %s83_s11 }
  0x47   :  { %s816_s13 = smov [#allocation2 + $0x1]   ;;  %s903_s16 = sld [smem:[#allocation6 + $0x2]]  ;;  %v228_v3 = vld [vmem:[#allocation10 + $0x8] sm:$0xff]  ;;  %v231_v4 = vsub.f32 %v227_v1, %v229_v2  ;;  %v230_v5 = vld [vmem:[#allocation12 + $0x8] sm:$0xff] }
  0x48   :  { %s103_s15 = sshll.u32 %s816_s13, 4  ;;  %s817_s3 = smov [#allocation2 + $0x2]   ;;  %v232_v7 = vsub.f32 %v228_v3, %v230_v5  ;;  %s905_s15 = int_to_ptr.vmem [resolvable:$true] %s103_s15 }
  0x49   :  { %s123_s7 = sshll.u32 %s817_s3, 4  ;;  %s907_s8 = sld [smem:[#allocation6 + $0x3]]  ;;  %v235_v8 = vmul.f32 %v231_v4, %v231_v4  ;;  %s909_s7 = int_to_ptr.vmem [resolvable:$true] %s123_s7 }
  0x4a   :  { %v236_v10 = vmul.f32 %v232_v7, %v232_v7  ;;  %s923_s24 = scalar_lea.hbm %s1099_s4, 256 }
  0x4b   :  { %p70_p1 = scmp.gt.s32.totalorder %s69_s9, 0  ;;  %p401_p2 = scmp.lt.s32.totalorder %s69_s9, 15 }
  0x4c   :  { %p88_p3 = scmp.gt.s32.totalorder %s407_s12, 0  ;;  %p408_p4 = scmp.lt.s32.totalorder %s407_s12, 15 }
  0x4d   :  { %s71_s14 = scalar_select %p70_p1, %s69_s9, 0  ;;  %v233_v6 = vld [vmem:[#allocation3] sm:$0xff]  ;;  %v234_v9 = vld [vmem:[#allocation3 + $0x8] sm:$0xff] }
  0x4e   :  { %s1104_s12 = smov (!%p88_p3, %s407_s12), 0  ;;  %v237_v11 = vadd.f32 %v235_v8, %v233_v6  ;;  %p108_p5 = scmp.gt.s32.totalorder %s903_s16, 0  ;;  %v238_v12 = vadd.f32 %v236_v10, %v234_v9 }
  0x4f   :  { %s1106_s14 = smov (!%p401_p2, %s71_s14), 15  ;;  %s1108_s12 = smov (!%p408_p4, %s1104_s12), 15 }
  0x50   :  { %s406_s17 = sshll.u32 %s1106_s14, 4  ;;  %s413_s21 = sshll.u32 %s1108_s12, 4  ;;  %240 = vst.msk [vmem:[#allocation3] sm:$0xff] %vm66_vm0, %v237_v11 }
  0x51   :  { %s75_s20 = scalar_lea.hbm %s1099_s4, %s406_s17 }
  0x52   :  { %s582_s2 = scalar_lea.hbm %s75_s20, 16  ;;  %p585_p7 = scmp.lt.u32.totalorder %s75_s20, %s1099_s4 }
  0x53   :  { %p583_p6 = scmp.ne.s32.totalorder %s75_s20, %s582_s2  ;;  %p586_p8 = scmp.lt.u32.totalorder %s923_s24, %s582_s2 }
  0x54   :  { %p588_p10 = scmp.lt.u32.totalorder %s582_s2, %s75_s20 }
  0x55   :  { %p587_p9 = por %p586_p8, %p585_p7 }
  0x57   :  { %p589_p11 = por %p588_p10, %p587_p9 }
  0x59   :  { %p590_p12 = pnand %p589_p11, %p583_p6 }
  0x5b   :  { %593 = shalt.err (!%p590_p12)  }
  0x5c   :  { %s594_s26 = scalar_lea.vmem %s901_s11, 16  ;;  %s932_s27 = scalar_lea.vmem %s901_s11, 128 }
  0x5d   :  { %p595_p13 = scmp.ne.s32.totalorder %s901_s11, %s594_s26  ;;  %p599_p0 = scmp.lt.s32.totalorder %s901_s11, %s901_s11 }
  0x5e   :  { %p600_p1 = scmp.lt.s32.totalorder %s932_s27, %s594_s26 }
  0x60   :  { %p601_p2 = por %p600_p1, %p599_p0 }
  0x62   :  { %p602_p3 = pnand %p601_p2, %p595_p13 }
  0x64   :  { %605 = shalt.err (!%p602_p3)  }
  0x65   :  { %86 = dma.hbm_to_vmem [thread:$0]  %s75_s20, 16, %s901_s11, [#allocation4]  ;;  %241 = vst.msk [vmem:[#allocation3 + $0x8] sm:$0xff] %vm66_vm0, %v238_v12 }
  0x66   :  { %s93_s30 = scalar_lea.hbm %s1099_s4, %s413_s21  ;;  %p415_p4 = scmp.lt.s32.totalorder %s903_s16, 15 }
  0x67   :  { %s606_s1 = scalar_lea.hbm %s93_s30, 16  ;;  %p609_p7 = scmp.lt.u32.totalorder %s93_s30, %s1099_s4 }
  0x68   :  { %p607_p6 = scmp.ne.s32.totalorder %s93_s30, %s606_s1  ;;  %p610_p8 = scmp.lt.u32.totalorder %s923_s24, %s606_s1 }
  0x69   :  { %p612_p10 = scmp.lt.u32.totalorder %s606_s1, %s93_s30 }
  0x6a   :  { %p611_p9 = por %p610_p8, %p609_p7 }
  0x6c   :  { %p613_p11 = por %p612_p10, %p611_p9 }
  0x6e   :  { %p614_p12 = pnand %p613_p11, %p607_p6 }
  0x70   :  { %617 = shalt.err (!%p614_p12)  }
  0x71   :  { %s618_s10 = scalar_lea.vmem %s905_s15, 16  ;;  %p623_p0 = scmp.lt.s32.totalorder %s905_s15, %s901_s11 }
  0x72   :  { %p619_p13 = scmp.ne.s32.totalorder %s905_s15, %s618_s10  ;;  %p624_p1 = scmp.lt.s32.totalorder %s932_s27, %s618_s10 }
  0x74   :  { %p625_p2 = por %p624_p1, %p623_p0 }
  0x76   :  { %p626_p3 = pnand %p625_p2, %p619_p13 }
  0x78   :  { %629 = shalt.err (!%p626_p3)  }
  0x79   :  { %106 = dma.hbm_to_vmem [thread:$0]  %s93_s30, 16, %s905_s15, [#allocation4 + $0x1] }
  0x7a   :  { %s109_s12 = scalar_select %p108_p5, %s903_s16, 0 }
  0x7b   :  { %p128_p6 = scmp.gt.s32.totalorder %s907_s8, 0  ;;  %p422_p7 = scmp.lt.s32.totalorder %s907_s8, 15 }
  0x7c   :  { %s1110_s12 = smov (!%p415_p4, %s109_s12), 15  ;;  %s818_s14 = smov [#allocation2 + $0x3]  }
  0x7d   :  { %s129_s13 = scalar_select %p128_p6, %s907_s8, 0 }
  0x7e   :  { %s420_s3 = sshll.u32 %s1110_s12, 4  ;;  %s143_s17 = sshll.u32 %s818_s14, 4  ;;  %s964_s17 = int_to_ptr.vmem [resolvable:$true] %s143_s17 }
  0x7f   :  { %s113_s20 = scalar_lea.hbm %s1099_s4, %s420_s3 }
  0x80   :  { %s630_s21 = scalar_lea.hbm %s113_s20, 16  ;;  %p633_p5 = scmp.lt.u32.totalorder %s113_s20, %s1099_s4 }
  0x81   :  { %p631_p8 = scmp.ne.s32.totalorder %s113_s20, %s630_s21  ;;  %p634_p9 = scmp.lt.u32.totalorder %s923_s24, %s630_s21 }
  0x82   :  { %p636_p11 = scmp.lt.u32.totalorder %s630_s21, %s113_s20 }
  0x83   :  { %p635_p10 = por %p634_p9, %p633_p5 }
  0x85   :  { %p637_p4 = por %p636_p11, %p635_p10 }
  0x87   :  { %p638_p12 = pnand %p637_p4, %p631_p8 }
  0x89   :  { %641 = shalt.err (!%p638_p12)  }
  0x8a   :  { %s642_s16 = scalar_lea.vmem %s909_s7, 16  ;;  %p647_p0 = scmp.lt.s32.totalorder %s909_s7, %s901_s11 }
  0x8b   :  { %p643_p13 = scmp.ne.s32.totalorder %s909_s7, %s642_s16  ;;  %p648_p1 = scmp.lt.s32.totalorder %s932_s27, %s642_s16 }
  0x8d   :  { %p649_p2 = por %p648_p1, %p647_p0 }
  0x8f   :  { %p650_p3 = pnand %p649_p2, %p643_p13 }
  0x91   :  { %653 = shalt.err (!%p650_p3)  }
  0x92   :  { %126 = dma.hbm_to_vmem [thread:$0]  %s113_s20, 16, %s909_s7, [#allocation4 + $0x2] }
  0x93   :  { %s1112_s13 = smov (!%p422_p7, %s129_s13), 15  ;;  %s978_s22 = sld [smem:[#allocation6 + $0x4]] }
  0x94   :  { %s427_s23 = sshll.u32 %s1112_s13, 4  ;;  %s819_s0 = smov [#allocation2 + $0x4]  }
  0x95   :  { %s163_s25 = sshll.u32 %s819_s0, 4  ;;  %s133_s29 = scalar_lea.hbm %s1099_s4, %s427_s23  ;;  %s983_s25 = int_to_ptr.vmem [resolvable:$true] %s163_s25 }
  0x96   :  { %s654_s30 = scalar_lea.hbm %s133_s29, 16  ;;  %p657_p8 = scmp.lt.u32.totalorder %s133_s29, %s1099_s4 }
  0x97   :  { %p655_p6 = scmp.ne.s32.totalorder %s133_s29, %s654_s30  ;;  %p658_p5 = scmp.lt.u32.totalorder %s923_s24, %s654_s30 }
  0x98   :  { %p660_p7 = scmp.lt.u32.totalorder %s654_s30, %s133_s29 }
  0x99   :  { %p659_p9 = por %p658_p5, %p657_p8 }
  0x9b   :  { %p661_p10 = por %p660_p7, %p659_p9 }
  0x9d   :  { %p662_p11 = pnand %p661_p10, %p655_p6 }
  0x9f   :  { %665 = shalt.err (!%p662_p11)  }
  0xa0   :  { %s666_s7 = scalar_lea.vmem %s964_s17, 16  ;;  %p671_p12 = scmp.lt.s32.totalorder %s964_s17, %s901_s11 }
  0xa1   :  { %p667_p4 = scmp.ne.s32.totalorder %s964_s17, %s666_s7  ;;  %p672_p13 = scmp.lt.s32.totalorder %s932_s27, %s666_s7 }
  0xa3   :  { %p673_p0 = por %p672_p13, %p671_p12 }
  0xa5   :  { %p674_p1 = pnand %p673_p0, %p667_p4 }
  0xa7   :  { %677 = shalt.err (!%p674_p1)  }
  0xa8   :  { %146 = dma.hbm_to_vmem [thread:$0]  %s133_s29, 16, %s964_s17, [#allocation4 + $0x3] }
  0xa9   :  { %s995_s8 = sld [smem:[#allocation6 + $0x5]]  ;;  %s820_s9 = smov [#allocation2 + $0x5]  }
  0xaa   :  { %s183_s10 = sshll.u32 %s820_s9, 4  ;;  %s997_s12 = sld [smem:[#allocation6 + $0x6]]  ;;  %s1001_s10 = int_to_ptr.vmem [resolvable:$true] %s183_s10 }
  0xab   :  { %p148_p2 = scmp.gt.s32.totalorder %s978_s22, 0  ;;  %p429_p3 = scmp.lt.s32.totalorder %s978_s22, 15 }
  0xac   :  { %s821_s13 = smov [#allocation2 + $0x6]   ;;  %s1006_s14 = sld [smem:[#allocation6 + $0x7]] }
  0xad   :  { %s1114_s22 = smov (!%p148_p2, %s978_s22), 0  ;;  %s1004_s3 = sshll.u32 %s821_s13, 4  ;;  %s1036_s3 = int_to_ptr.vmem [resolvable:$true] %s1004_s3 }
  0xae   :  { %s1116_s22 = smov (!%p429_p3, %s1114_s22), 15 }
  0xaf   :  { %p168_p6 = scmp.gt.s32.totalorder %s995_s8, 0  ;;  %s434_s17 = sshll.u32 %s1116_s22, 4 }
  0xb0   :  { %p188_p5 = scmp.gt.s32.totalorder %s997_s12, 0  ;;  %s153_s20 = scalar_lea.hbm %s1099_s4, %s434_s17 }
  0xb1   :  { %s678_s21 = scalar_lea.hbm %s153_s20, 16  ;;  %p681_p10 = scmp.lt.u32.totalorder %s153_s20, %s1099_s4 }
  0xb2   :  { %p679_p7 = scmp.ne.s32.totalorder %s153_s20, %s678_s21  ;;  %p682_p11 = scmp.lt.u32.totalorder %s923_s24, %s678_s21 }
  0xb3   :  { %p684_p12 = scmp.lt.u32.totalorder %s678_s21, %s153_s20 }
  0xb4   :  { %p683_p4 = por %p682_p11, %p681_p10 }
  0xb6   :  { %p685_p13 = por %p684_p12, %p683_p4 }
  0xb8   :  { %p686_p0 = pnand %p685_p13, %p679_p7 }
  0xba   :  { %689 = shalt.err (!%p686_p0)  }
  0xbb   :  { %s690_s16 = scalar_lea.vmem %s983_s25, 16  ;;  %p695_p2 = scmp.lt.s32.totalorder %s983_s25, %s901_s11 }
  0xbc   :  { %p691_p1 = scmp.ne.s32.totalorder %s983_s25, %s690_s16  ;;  %p696_p3 = scmp.lt.s32.totalorder %s932_s27, %s690_s16 }
  0xbe   :  { %p697_p9 = por %p696_p3, %p695_p2 }
  0xc0   :  { %p698_p8 = pnand %p697_p9, %p691_p1 }
  0xc2   :  { %701 = shalt.err (!%p698_p8)  }
  0xc3   :  { %166 = dma.hbm_to_vmem [thread:$0]  %s153_s20, 16, %s983_s25, [#allocation4 + $0x4] }
  0xc4   :  { %s169_s22 = scalar_select %p168_p6, %s995_s8, 0 }
  0xc5   :  { %s189_s23 = scalar_select %p188_p5, %s997_s12, 0 }
  0xc6   :  { %p1101_p7 = scmp.lt.s32.totalorder %s995_s8, 15  ;;  %p1102_p10 = scmp.lt.s32.totalorder %s997_s12, 15 }
  0xc8   :  { %s1118_s22 = smov (!%p1101_p7, %s169_s22), 15  ;;  %s1120_s23 = smov (!%p1102_p10, %s189_s23), 15 }
  0xc9   :  { %s441_s0 = sshll.u32 %s1118_s22, 4  ;;  %s448_s30 = sshll.u32 %s1120_s23, 4 }
  0xca   :  { %s173_s29 = scalar_lea.hbm %s1099_s4, %s441_s0 }
  0xcb   :  { %s702_s1 = scalar_lea.hbm %s173_s29, 16  ;;  %p705_p6 = scmp.lt.u32.totalorder %s173_s29, %s1099_s4 }
  0xcc   :  { %p703_p8 = scmp.ne.s32.totalorder %s173_s29, %s702_s1  ;;  %p706_p9 = scmp.lt.u32.totalorder %s923_s24, %s702_s1 }
  0xcd   :  { %p708_p11 = scmp.lt.u32.totalorder %s702_s1, %s173_s29 }
  0xce   :  { %p707_p5 = por %p706_p9, %p705_p6 }
  0xd0   :  { %p709_p4 = por %p708_p11, %p707_p5 }
  0xd2   :  { %p710_p12 = pnand %p709_p4, %p703_p8 }
  0xd4   :  { %713 = shalt.err (!%p710_p12)  }
  0xd5   :  { %s714_s7 = scalar_lea.vmem %s1001_s10, 16  ;;  %p719_p0 = scmp.lt.s32.totalorder %s1001_s10, %s901_s11 }
  0xd6   :  { %p715_p13 = scmp.ne.s32.totalorder %s1001_s10, %s714_s7  ;;  %p720_p1 = scmp.lt.s32.totalorder %s932_s27, %s714_s7 }
  0xd8   :  { %p721_p2 = por %p720_p1, %p719_p0 }
  0xda   :  { %p722_p3 = pnand %p721_p2, %p715_p13 }
  0xdc   :  { %725 = shalt.err (!%p722_p3)  }
  0xdd   :  { %186 = dma.hbm_to_vmem [thread:$0]  %s173_s29, 16, %s1001_s10, [#allocation4 + $0x5] }
  0xde   :  { %s193_s12 = scalar_lea.hbm %s1099_s4, %s448_s30  ;;  %p208_p7 = scmp.gt.s32.totalorder %s1006_s14, 0 }
  0xdf   :  { %s726_s13 = scalar_lea.hbm %s193_s12, 16  ;;  %p729_p8 = scmp.lt.u32.totalorder %s193_s12, %s1099_s4 }
  0xe0   :  { %p727_p10 = scmp.ne.s32.totalorder %s193_s12, %s726_s13  ;;  %p730_p6 = scmp.lt.u32.totalorder %s923_s24, %s726_s13 }
  0xe1   :  { %p732_p5 = scmp.lt.u32.totalorder %s726_s13, %s193_s12 }
  0xe2   :  { %p731_p9 = por %p730_p6, %p729_p8 }
  0xe4   :  { %p733_p11 = por %p732_p5, %p731_p9 }
  0xe6   :  { %p734_p4 = pnand %p733_p11, %p727_p10 }
  0xe8   :  { %737 = shalt.err (!%p734_p4)  }
  0xe9   :  { %s738_s10 = scalar_lea.vmem %s1036_s3, 16  ;;  %p743_p13 = scmp.lt.s32.totalorder %s1036_s3, %s901_s11 }
  0xea   :  { %p739_p12 = scmp.ne.s32.totalorder %s1036_s3, %s738_s10  ;;  %p744_p0 = scmp.lt.s32.totalorder %s932_s27, %s738_s10 }
  0xec   :  { %p745_p1 = por %p744_p0, %p743_p13 }
  0xee   :  { %p746_p2 = pnand %p745_p1, %p739_p12 }
  0xf0   :  { %749 = shalt.err (!%p746_p2)  }
  0xf1   :  { %206 = dma.hbm_to_vmem [thread:$0]  %s193_s12, 16, %s1036_s3, [#allocation4 + $0x6] }
  0xf2   :  { %s209_s19 = scalar_select %p208_p7, %s1006_s14, 0 }
  0xf3   :  { %p450_p3 = scmp.lt.s32.totalorder %s1006_s14, 15  ;;  %s822_s20 = smov [#allocation2 + $0x7]  }
  0xf4   :  { %s223_s21 = sshll.u32 %s822_s20, 4  ;;  %s224_s21 = int_to_ptr.vmem [resolvable:$true] %s223_s21 }
  0xf5   :  { %s1122_s19 = smov (!%p450_p3, %s209_s19), 15 }
  0xf6   :  { %s455_s2 = sshll.u32 %s1122_s19, 4 }
  0xf7   :  { %s213_s22 = scalar_lea.hbm %s1099_s4, %s455_s2 }
  0xf8   :  { %s750_s23 = scalar_lea.hbm %s213_s22, 16  ;;  %p753_p8 = scmp.lt.u32.totalorder %s213_s22, %s1099_s4 }
  0xf9   :  { %p751_p10 = scmp.ne.s32.totalorder %s213_s22, %s750_s23  ;;  %p754_p6 = scmp.lt.u32.totalorder %s923_s24, %s750_s23 }
  0xfa   :  { %p756_p5 = scmp.lt.u32.totalorder %s750_s23, %s213_s22 }
  0xfb   :  { %p755_p9 = por %p754_p6, %p753_p8 }
  0xfd   :  { %p757_p7 = por %p756_p5, %p755_p9 }
  0xff   :  { %p758_p11 = pnand %p757_p7, %p751_p10 }
 0x101   :  { %761 = shalt.err (!%p758_p11)  }
 0x102   :  { %s762_s3 = scalar_lea.vmem %s224_s21, 16  ;;  %p767_p12 = scmp.lt.s32.totalorder %s224_s21, %s901_s11 }
 0x103   :  { %p763_p4 = scmp.ne.s32.totalorder %s224_s21, %s762_s3  ;;  %p768_p13 = scmp.lt.s32.totalorder %s932_s27, %s762_s3 }
 0x105   :  { %p769_p0 = por %p768_p13, %p767_p12 }
 0x107   :  { %p770_p1 = pnand %p769_p0, %p763_p4 }
 0x109   :  { %773 = shalt.err (!%p770_p1)  }
 0x10a   :  { %226 = dma.hbm_to_vmem [thread:$0]  %s213_s22, 16, %s224_s21, [#allocation4 + $0x7] }
 0x10b   :  { %790 = dma.done.wait [#allocation4], 16 }
 0x10c   :  { %791 = vsyncadd [#allocation4], 4294967280 }
 0x10d   :  { %792 = dma.done.wait [#allocation4 + $0x1], 16 }
 0x10e   :  { %793 = vsyncadd [#allocation4 + $0x1], 4294967280 }
 0x10f   :  { %794 = dma.done.wait [#allocation4 + $0x2], 16 }
 0x110   :  { %795 = vsyncadd [#allocation4 + $0x2], 4294967280 }
 0x111   :  { %796 = dma.done.wait [#allocation4 + $0x3], 16 }
 0x112   :  { %797 = vsyncadd [#allocation4 + $0x3], 4294967280 }
 0x113   :  { %798 = dma.done.wait [#allocation4 + $0x4], 16 }
 0x114   :  { %799 = vsyncadd [#allocation4 + $0x4], 4294967280 }
 0x115   :  { %800 = dma.done.wait [#allocation4 + $0x5], 16 }
 0x116   :  { %801 = vsyncadd [#allocation4 + $0x5], 4294967280 }
 0x117   :  { %802 = dma.done.wait [#allocation4 + $0x6], 16 }
 0x118   :  { %803 = vsyncadd [#allocation4 + $0x6], 4294967280 }
 0x119   :  { %804 = dma.done.wait [#allocation4 + $0x7], 16 }
 0x11a   :  { %805 = vsyncadd [#allocation4 + $0x7], 4294967280  ;;  %v269_v13 = vld [vmem:[#allocation7] sm:$0xff]  ;;  %v283_v24 = vld [vmem:[#allocation2] sm:$0xff]  ;;  %s774_s1 = scalar_lea.hbm %s1100_s5, 16 }
 0x11b   :  { %v270_v14 = vsel %vm66_vm0, %v269_v13, -inf  ;;  %v297_v25 = vld [vmem:[#allocation3] sm:$0xff]  ;;  %v298_v26 = vld [vmem:[#allocation3 + $0x8] sm:$0xff]  ;;  %p775_p2 = scmp.ne.s32.totalorder %s1100_s5, %s774_s1  ;;  %p778_p3 = scmp.lt.u32.totalorder %s774_s1, %s1100_s5 }
 0x11c   :  { %271 = vmax.xlane.f32.xlu0 %v270_v14  ;;  %v299_v29 = vsel %vm66_vm0, %v297_v25, 0.0  ;;  %v300_v30 = vsel %vm66_vm0, %v298_v26, 0.0 }
 0x11d   :  { %v301_v32 = vadd.f32 %v300_v30, %v299_v29  ;;  %p780_p10 = pnand %p778_p3, %p775_p2 }
 0x1a9   :  { %v272_v15 = vpop.xlane.xlu0 %271 }
 0x1aa   :  { %v273_v16 = vsub.f32 %v269_v13, %v272_v15 }
 0x1ac   :  { %v274_v17 = vmul.f32 1.442695, %v273_v16 }
 0x1ae   :  { %500 = vpow2.f32 %v274_v17 }
 0x1b8   :  { %v501_v18 = vpop.eup %500 }
 0x1b9   :  { %v276_v19 = vsel %vm66_vm0, %v501_v18, 0.0 }
 0x1ba   :  { %277 = vadd.xlane.f32.xlu0 %v276_v19 }
 0x247   :  { %v278_v20 = vpop.xlane.xlu0 %277 }
 0x248   :  { %502 = vlog2.f32 %v278_v20 }
 0x252   :  { %v503_v21 = vpop.eup %502 }
 0x253   :  { %v280_v22 = vmul.f32 0.6931472, %v503_v21 }
 0x255   :  { %v281_v23 = vadd.f32 %v280_v22, %v272_v15 }
 0x257   :  { %v282_v27 = vsub.f32 %v269_v13, %v281_v23 }
 0x259   :  { %v284_v28 = vmul.f32 %v283_v24, %v282_v27 }
 0x25b   :  { %v285_v31 = vsel %vm66_vm0, %v284_v28, 0.0 }
 0x25c   :  { %286 = vadd.xlane.f32.xlu1 %v285_v31 }
 0x260   :  { %302 = vadd.xlane.f32.xlu1 %v301_v32 }
 0x2e9   :  { %v287_v33 = vpop.xlane.xlu1 %286 }
 0x2ea   :  { %v288_v34 = vrot.slane %v287_v33, 4 }
 0x2ec   :  { %v289_v35 = vadd.f32 %v288_v34, %v287_v33 }
 0x2ed   :  { %v303_v36 = vpop.xlane.xlu1 %302 }
 0x2ee   :  { %v290_v37 = vrot.slane %v289_v35, 2  ;;  %v304_v38 = vrot.slane %v303_v36, 4 }
 0x2f0   :  { %v305_v39 = vadd.f32 %v304_v38, %v303_v36  ;;  %v291_v40 = vadd.f32 %v290_v37, %v289_v35 }
 0x2f2   :  { %v306_v41 = vrot.slane %v305_v39, 2  ;;  %v292_v42 = vrot.slane %v291_v40, 1 }
 0x2f4   :  { %v307_v43 = vadd.f32 %v306_v41, %v305_v39  ;;  %v293_v44 = vadd.f32 %v292_v42, %v291_v40 }
 0x2f6   :  { %480 = vpush %v293_v44  ;;  %v308_v45 = vrot.slane %v307_v43, 1 }
 0x2f8   :  { %v309_v46 = vadd.f32 %v308_v45, %v307_v43 }
 0x2fa   :  { %482 = vpush %v309_v46 }
 0x327   :  { %s481_s4 = spop %480 }
 0x328   :  { %s295_s11 = ssub.f32 0.0, %s481_s4 }
 0x32a   :  { %s296_s24 = smul.f32 0.0125, %s295_s11 }
 0x32b   :  { %s483_s27 = spop %482 }
 0x32c   :  { %s311_s14 = smul.f32 0.5, %s483_s27 }
 0x32e   :  { %s312_s28 = sadd.f32 %s311_s14, %s296_s24 }
 0x330   :  { %314 = sst [smem:[#allocation13]] %s312_s28 }
 0x331   :  { %783 = shalt.err (!%p780_p10)
}
 0x332   :  { %s823_s9 = smov [#allocation13]  }
 0x333   :  { %322 = dma.smem_to_hbm %s823_s9, 16, %s1100_s5, [#allocation9]  }
 0x334   :  { %806 = dma.done.wait [#allocation9], 16  }
 0x335   :  { %807 = vsyncadd [#allocation9], 4294967280 }
 0x336   :  { %326 = sfence }
 0x337   :  { %327 = vsyncpa [#allocation8], 1 }
 0x338   :  { %328 = vsyncpa [#allocation11], 1 }
 0x339   :  { %329 = vsyncpa [#allocation9], 1 }
 0x33a   :  { %330 = vsyncmov [#allocation4] }
 0x33d   :  { %s331_s17 = vpop.sfrf %330 }
 0x33e   :  { %p456_p8 = scmp.ne.s32.totalorder %s331_s17, 0 }
 0x340   :  { %335 = shalt.err (%p456_p8)  }
 0x341   :  { %337 = vsyncmov [#allocation4 + $0x1] }
 0x344   :  { %s338_s18 = vpop.sfrf %337 }
 0x345   :  { %p457_p6 = scmp.ne.s32.totalorder %s338_s18, 0 }
 0x347   :  { %342 = shalt.err (%p457_p6)  }
 0x348   :  { %344 = vsyncmov [#allocation4 + $0x2] }
 0x34b   :  { %s345_s10 = vpop.sfrf %344 }
 0x34c   :  { %p458_p9 = scmp.ne.s32.totalorder %s345_s10, 0 }
 0x34e   :  { %349 = shalt.err (%p458_p9)  }
 0x34f   :  { %351 = vsyncmov [#allocation4 + $0x3] }
 0x352   :  { %s352_s5 = vpop.sfrf %351 }
 0x353   :  { %p459_p5 = scmp.ne.s32.totalorder %s352_s5, 0 }
 0x355   :  { %356 = shalt.err (%p459_p5)  }
 0x356   :  { %358 = vsyncmov [#allocation4 + $0x4] }
 0x359   :  { %s359_s19 = vpop.sfrf %358 }
 0x35a   :  { %p460_p7 = scmp.ne.s32.totalorder %s359_s19, 0 }
 0x35c   :  { %363 = shalt.err (%p460_p7)  }
 0x35d   :  { %365 = vsyncmov [#allocation4 + $0x5] }
 0x360   :  { %s366_s20 = vpop.sfrf %365 }
 0x361   :  { %p461_p11 = scmp.ne.s32.totalorder %s366_s20, 0 }
 0x363   :  { %370 = shalt.err (%p461_p11)  }
 0x364   :  { %372 = vsyncmov [#allocation4 + $0x6] }
 0x367   :  { %s373_s21 = vpop.sfrf %372 }
 0x368   :  { %p462_p4 = scmp.ne.s32.totalorder %s373_s21, 0 }
 0x36a   :  { %377 = shalt.err (%p462_p4)  }
 0x36b   :  { %379 = vsyncmov [#allocation4 + $0x7] }
 0x36e   :  { %s380_s2 = vpop.sfrf %379 }
 0x36f   :  { %p463_p12 = scmp.ne.s32.totalorder %s380_s2, 0 }
 0x371   :  { %384 = shalt.err (%p463_p12)  }

</bundles_post_ra>
